<compile_context>
chip_gen: v7x
topology: tpu7x:2x2x1
jax: 0.10.0
libtpu: 0.0.40
codegen_flags: <defaults>
</compile_context>

<pallas_src>
import functools

import jax
import jax.numpy as jnp
from jax.experimental import pallas as pl
from jax.experimental.pallas import tpu as pltpu

CONDS = 6
TARGETS = 4
IN_DIM = TARGETS + CONDS   # 10
HID = 128
OUT_PAD = 128              # lane-dense padded output width


def _mlp_kernel(x_ref, w1_ref, b1_ref, w2_ref, b2_ref, w3_ref, b3_ref, o_ref):
    # Entire 3-layer MLP on one batch tile; all operands resident in VMEM.
    x = x_ref[...]
    h1 = jnp.dot(x, w1_ref[...], preferred_element_type=jnp.float32) + b1_ref[...]
    h1 = jnp.maximum(h1, 0.0)
    h2 = jnp.dot(h1, w2_ref[...], preferred_element_type=jnp.float32) + b2_ref[...]
    h2 = jnp.maximum(h2, 0.0)
    out = jnp.dot(h2, w3_ref[...], preferred_element_type=jnp.float32) + b3_ref[...]
    o_ref[...] = out.astype(o_ref.dtype)


@functools.partial(jax.jit, static_argnames=("tm",))
def generator_forward(x, params, tm=512):
    """x: (B, 10) float32, any B >= 1.  tm: max batch tile (multiple of 8)."""
    assert tm % 8 == 0, "batch tile must be a multiple of the sublane width (8)"
    w1, b1, w2, b2, w3, b3 = params
    B = x.shape[0]

    # Lane-dense output: pad W3 / b3 with zero columns up to 128 lanes so the
    # output store is a full-lane vst instead of a masked 4-wide partial store.
    w3p = jnp.pad(w3, ((0, 0), (0, OUT_PAD - TARGETS)))
    b3p = jnp.pad(b3, ((0, 0), (0, OUT_PAD - TARGETS)))

    # Effective batch tile: at least 8, at most tm; pad the batch to the tile.
    # Small batches (B <= tm) collapse to grid=(1,); large batches get >= 2
    # parallel grid steps (lets v7x shard across its two TensorCores).
    b_round8 = ((B + 7) // 8) * 8
    tm_eff = min(tm, b_round8)
    B_pad = ((B + tm_eff - 1) // tm_eff) * tm_eff
    if B_pad != B:
        x = jnp.pad(x, ((0, B_pad - B), (0, 0)))

    grid = (B_pad // tm_eff,)

    # Weights / biases are small -> full-array blocks, resident across grid steps.
    def w_spec(shape):
        return pl.BlockSpec(shape, lambda i: (0, 0))

    out = pl.pallas_call(
        _mlp_kernel,
        out_shape=jax.ShapeDtypeStruct((B_pad, OUT_PAD), jnp.float32),
        grid_spec=pltpu.PrefetchScalarGridSpec(
            num_scalar_prefetch=0,
            grid=grid,
            in_specs=[
                pl.BlockSpec((tm_eff, IN_DIM), lambda i: (i, 0)),  # x tile over batch
                w_spec((IN_DIM, HID)),                             # w1
                w_spec((1, HID)),                                  # b1
                w_spec((HID, HID)),                                # w2
                w_spec((1, HID)),                                  # b2
                w_spec((HID, OUT_PAD)),                            # w3 (padded)
                w_spec((1, OUT_PAD)),                              # b3 (padded)
            ],
            out_specs=pl.BlockSpec((tm_eff, OUT_PAD), lambda i: (i, 0)),
        ),
        compiler_params=pltpu.CompilerParams(
            dimension_semantics=("parallel",),
        ),
    )(x, w1, b1, w2, b2, w3p, b3p)

    # Strip batch padding and the lane padding on the output width.
    return out[:B, :TARGETS]


def init_params(key):
    """Deterministic init mimicking PyTorch nn.Linear default (U(-1/sqrt(fan_in), +))."""
    def linear(key, fan_in, fan_out):
        kw, kb = jax.random.split(key)
        bound = 1.0 / jnp.sqrt(float(fan_in))
        # stored as (in, out) so kernel does x @ W
        w = jax.random.uniform(kw, (fan_in, fan_out), jnp.float32, -bound, bound)
        b = jax.random.uniform(kb, (1, fan_out), jnp.float32, -bound, bound)
        return w, b

    k1, k2, k3 = jax.random.split(key, 3)
    w1, b1 = linear(k1, IN_DIM, HID)
    w2, b2 = linear(k2, HID, HID)
    w3, b3 = linear(k3, HID, TARGETS)
    return (w1, b1, w2, b2, w3, b3)


def reference_forward(x, params):
    w1, b1, w2, b2, w3, b3 = params
    h1 = jnp.maximum(x @ w1 + b1, 0.0)
    h2 = jnp.maximum(h1 @ w2 + b2, 0.0)
    return h2 @ w3 + b3


if __name__ == "__main__":
    key = jax.random.PRNGKey(0)
    kx, kp = jax.random.split(key)

    # Small batch, intentionally NOT a multiple of 8 to exercise the pad path.
    B = 12
    x = jax.random.normal(kx, (B, IN_DIM), dtype=jnp.float32)
    params = init_params(kp)

    out = generator_forward(x, params)
    out = jax.block_until_ready(out)

    ref = reference_forward(x, params)
    assert out.shape == (B, TARGETS)
    assert jnp.allclose(out, ref, atol=1e-5, rtol=1e-5), "mismatch vs JAX reference"

    print("KERNEL_OK")
</pallas_src>

<mosaic_0001>
module attributes {stable_mosaic.version = 11 : i64} {
  func.func @_mlp_kernel(%arg0: i32, %arg1: memref<16x10xf32, #tpu.memory_space<vmem>>, %arg2: memref<10x128xf32, #tpu.memory_space<vmem>>, %arg3: memref<1x128xf32, #tpu.memory_space<vmem>>, %arg4: memref<128x128xf32, #tpu.memory_space<vmem>>, %arg5: memref<1x128xf32, #tpu.memory_space<vmem>>, %arg6: memref<128x128xf32, #tpu.memory_space<vmem>>, %arg7: memref<1x128xf32, #tpu.memory_space<vmem>>, %arg8: memref<16x128xf32, #tpu.memory_space<vmem>>) attributes {dimension_semantics = [#tpu.dimension_semantics<parallel>], iteration_bounds = array<i64: 1>, scalar_prefetch = 0 : i64, scratch_operands = 0 : i64, tpu.core_type = #tpu.core_type<tc>, window_params = [{transform_indices = @transform_0, window_bounds = array<i64: 16, 10>}, {pipeline_mode = #tpu.pipeline_mode<synchronous>, transform_indices = @transform_1, window_bounds = array<i64: 10, 128>}, {pipeline_mode = #tpu.pipeline_mode<synchronous>, transform_indices = @transform_2, window_bounds = array<i64: 1, 128>}, {pipeline_mode = #tpu.pipeline_mode<synchronous>, transform_indices = @transform_3, window_bounds = array<i64: 128, 128>}, {pipeline_mode = #tpu.pipeline_mode<synchronous>, transform_indices = @transform_4, window_bounds = array<i64: 1, 128>}, {pipeline_mode = #tpu.pipeline_mode<synchronous>, transform_indices = @transform_5, window_bounds = array<i64: 128, 128>}, {pipeline_mode = #tpu.pipeline_mode<synchronous>, transform_indices = @transform_6, window_bounds = array<i64: 1, 128>}, {transform_indices = @transform_7, window_bounds = array<i64: 16, 128>}]} {
    %c0 = arith.constant 0 : index
    %c0_0 = arith.constant 0 : index
    %0 = vector.load %arg1[%c0, %c0_0] : memref<16x10xf32, #tpu.memory_space<vmem>>, vector<16x10xf32>
    %c0_1 = arith.constant 0 : index
    %c0_2 = arith.constant 0 : index
    %1 = vector.load %arg2[%c0_1, %c0_2] : memref<10x128xf32, #tpu.memory_space<vmem>>, vector<10x128xf32>
    %cst = arith.constant dense<0.000000e+00> : vector<16x128xf32>
    %2 = tpu.matmul %0, %1, %cst {dimension_numbers = #tpu.dot_dimension_numbers<[1], [0], [0], [1], [0, 0, 1, 1], [], []>} : vector<16x10xf32>, vector<10x128xf32>, vector<16x128xf32> -> vector<16x128xf32>
    %c0_3 = arith.constant 0 : index
    %c0_4 = arith.constant 0 : index
    %3 = vector.load %arg3[%c0_3, %c0_4] : memref<1x128xf32, #tpu.memory_space<vmem>>, vector<1x128xf32>
    %4 = vector.broadcast %3 : vector<1x128xf32> to vector<16x128xf32>
    %5 = arith.addf %2, %4 : vector<16x128xf32>
    %cst_5 = arith.constant 0.000000e+00 : f32
    %6 = vector.broadcast %cst_5 : f32 to vector<16x128xf32>
    %7 = arith.maximumf %5, %6 : vector<16x128xf32>
    %c0_6 = arith.constant 0 : index
    %c0_7 = arith.constant 0 : index
    %8 = vector.load %arg4[%c0_6, %c0_7] : memref<128x128xf32, #tpu.memory_space<vmem>>, vector<128x128xf32>
    %cst_8 = arith.constant dense<0.000000e+00> : vector<16x128xf32>
    %9 = tpu.matmul %7, %8, %cst_8 {dimension_numbers = #tpu.dot_dimension_numbers<[1], [0], [0], [1], [0, 0, 1, 1], [], []>} : vector<16x128xf32>, vector<128x128xf32>, vector<16x128xf32> -> vector<16x128xf32>
    %c0_9 = arith.constant 0 : index
    %c0_10 = arith.constant 0 : index
    %10 = vector.load %arg5[%c0_9, %c0_10] : memref<1x128xf32, #tpu.memory_space<vmem>>, vector<1x128xf32>
    %11 = vector.broadcast %10 : vector<1x128xf32> to vector<16x128xf32>
    %12 = arith.addf %9, %11 : vector<16x128xf32>
    %cst_11 = arith.constant 0.000000e+00 : f32
    %13 = vector.broadcast %cst_11 : f32 to vector<16x128xf32>
    %14 = arith.maximumf %12, %13 : vector<16x128xf32>
    %c0_12 = arith.constant 0 : index
    %c0_13 = arith.constant 0 : index
    %15 = vector.load %arg6[%c0_12, %c0_13] : memref<128x128xf32, #tpu.memory_space<vmem>>, vector<128x128xf32>
    %cst_14 = arith.constant dense<0.000000e+00> : vector<16x128xf32>
    %16 = tpu.matmul %14, %15, %cst_14 {dimension_numbers = #tpu.dot_dimension_numbers<[1], [0], [0], [1], [0, 0, 1, 1], [], []>} : vector<16x128xf32>, vector<128x128xf32>, vector<16x128xf32> -> vector<16x128xf32>
    %c0_15 = arith.constant 0 : index
    %c0_16 = arith.constant 0 : index
    %17 = vector.load %arg7[%c0_15, %c0_16] : memref<1x128xf32, #tpu.memory_space<vmem>>, vector<1x128xf32>
    %18 = vector.broadcast %17 : vector<1x128xf32> to vector<16x128xf32>
    %19 = arith.addf %16, %18 : vector<16x128xf32>
    %c0_17 = arith.constant 0 : index
    %c0_18 = arith.constant 0 : index
    %20 = vector.load %arg8[%c0_17, %c0_18] : memref<16x128xf32, #tpu.memory_space<vmem>>, vector<16x128xf32>
    tpu.vector_store %arg8[%c0_17, %c0_18], %19 {strides = array<i32>} : memref<16x128xf32, #tpu.memory_space<vmem>>, vector<16x128xf32>,
    return
  }
  func.func @transform_0(%arg0: i32) -> (i32, i32) {
    %c0_i32 = arith.constant 0 : i32
    %c0_i32_0 = arith.constant 0 : i32
    return %arg0, %c0_i32 : i32, i32
  }
  func.func @transform_1(%arg0: i32) -> (i32, i32) {
    %c0_i32 = arith.constant 0 : i32
    %c0_i32_0 = arith.constant 0 : i32
    %c0_i32_1 = arith.constant 0 : i32
    return %c0_i32, %c0_i32_0 : i32, i32
  }
  func.func @transform_2(%arg0: i32) -> (i32, i32) {
    %c0_i32 = arith.constant 0 : i32
    %c0_i32_0 = arith.constant 0 : i32
    %c0_i32_1 = arith.constant 0 : i32
    return %c0_i32, %c0_i32_0 : i32, i32
  }
  func.func @transform_3(%arg0: i32) -> (i32, i32) {
    %c0_i32 = arith.constant 0 : i32
    %c0_i32_0 = arith.constant 0 : i32
    %c0_i32_1 = arith.constant 0 : i32
    return %c0_i32, %c0_i32_0 : i32, i32
  }
  func.func @transform_4(%arg0: i32) -> (i32, i32) {
    %c0_i32 = arith.constant 0 : i32
    %c0_i32_0 = arith.constant 0 : i32
    %c0_i32_1 = arith.constant 0 : i32
    return %c0_i32, %c0_i32_0 : i32, i32
  }
  func.func @transform_5(%arg0: i32) -> (i32, i32) {
    %c0_i32 = arith.constant 0 : i32
    %c0_i32_0 = arith.constant 0 : i32
    %c0_i32_1 = arith.constant 0 : i32
    return %c0_i32, %c0_i32_0 : i32, i32
  }
  func.func @transform_6(%arg0: i32) -> (i32, i32) {
    %c0_i32 = arith.constant 0 : i32
    %c0_i32_0 = arith.constant 0 : i32
    %c0_i32_1 = arith.constant 0 : i32
    return %c0_i32, %c0_i32_0 : i32, i32
  }
  func.func @transform_7(%arg0: i32) -> (i32, i32) {
    %c0_i32 = arith.constant 0 : i32
    %c0_i32_0 = arith.constant 0 : i32
    return %arg0, %c0_i32 : i32, i32
  }
}

</mosaic_0001>

<bundles_post_ra>
// kernel: generator_forward.1
= control target key start
LH: loop header
LB: loop body
LE: loop exit
PB: predicated region body
PF: predicated region fallthrough
CT: control target
= control target key end

     0   :  { %vm44_vm0 = vcmask 1041408   ;;  %vm37_vm1 = vcmask 80896   ;;  %vm523_vm2 = vmmov 1   ;;  %s689_s1 = inlined_call_operand.vmem [shape: f32[10,128], index: 1, kind: input, shape index: {}]   ;;  %s690_s0 = inlined_call_operand.vmem [shape: f32[16,10], index: 0, kind: input, shape index: {}]   ;;  %s691_s3 = inlined_call_operand.vmem [shape: f32[128,128], index: 3, kind: input, shape index: {}]   ;;  %s692_s5 = inlined_call_operand.vmem [shape: f32[128,128], index: 5, kind: input, shape index: {}]   ;;  %s693_s2 = inlined_call_operand.vmem [shape: f32[1,128], index: 2, kind: input, shape index: {}]   ;;  %s694_s4 = inlined_call_operand.vmem [shape: f32[1,128], index: 4, kind: input, shape index: {}]   ;;  %s695_s6 = inlined_call_operand.vmem [shape: f32[1,128], index: 6, kind: input, shape index: {}]   ;;  %s696_s7 = inlined_call_operand.vmem [shape: f32[16,128], index: 7, kind: output, shape index: {}]  }
   0x1   :  { %v28_v0 = vld [vmem:[%s689_s1] sm:$0xff]  ;;  %v29_v1 = vld [vmem:[%s689_s1 + $0x8] sm:$0x3]  ;;  %vm453_vm3 = vmpackc.low %vm44_vm0, %vm523_vm2 }
   0x2   :  { %v452_v2 = vpack.c.bf16 %v29_v1, %v28_v0  ;;  %v26_v3 = vld [vmem:[%s690_s0] sm:$0xff]  ;;  %v126_v5 = vld [vmem:[%s691_s3 + $0x8] sm:$0xff]  ;;  %v127_v6 = vld [vmem:[%s691_s3 + $0x10] sm:$0xff] }
   0x3   :  { %v125_v4 = vld [vmem:[%s691_s3] sm:$0xff]  ;;  %379 = vmatprep.mubr.msk.f32.mxu0 %vm37_vm1, %v26_v3  ;;  %v128_v7 = vld [vmem:[%s691_s3 + $0x18] sm:$0xff]  ;;  %v27_v10 = vld [vmem:[%s690_s0 + $0x8] sm:$0xff] }
   0x4   :  { %454 = vmatprep.subr.msk.bf16.mxu0 %vm453_vm3, %v452_v2  ;;  %v458_v8 = vpack.c.bf16 %v126_v5, %v125_v4  ;;  %v462_v9 = vpack.c.bf16 %v128_v7, %v127_v6  ;;  %v129_v11 = vld [vmem:[%s691_s3 + $0x20] sm:$0xff]  ;;  %v130_v12 = vld [vmem:[%s691_s3 + $0x28] sm:$0xff]  ;;  %v131_v14 = vld [vmem:[%s691_s3 + $0x30] sm:$0xff] }
   0x5   :  { %457 = vmatpush3.bf16.msk.msra.mxu0 %vm453_vm3, %v452_v2  ;;  %v466_v13 = vpack.c.bf16 %v130_v12, %v129_v11  ;;  %v132_v15 = vld [vmem:[%s691_s3 + $0x38] sm:$0xff]  ;;  %v133_v17 = vld [vmem:[%s691_s3 + $0x40] sm:$0xff]  ;;  %v134_v18 = vld [vmem:[%s691_s3 + $0x48] sm:$0xff] }
   0x6   :  { %459 = vmatprep.subr.bf16.mxu1 %v458_v8  ;;  %v470_v16 = vpack.c.bf16 %v132_v15, %v131_v14  ;;  %v474_v19 = vpack.c.bf16 %v134_v18, %v133_v17  ;;  %v135_v20 = vld [vmem:[%s691_s3 + $0x50] sm:$0xff]  ;;  %v136_v21 = vld [vmem:[%s691_s3 + $0x58] sm:$0xff]  ;;  %v137_v23 = vld [vmem:[%s691_s3 + $0x60] sm:$0xff] }
   0x7   :  { %461 = vmatpush3.bf16.msra.mxu1 %v458_v8  ;;  %v478_v22 = vpack.c.bf16 %v136_v21, %v135_v20  ;;  %v138_v24 = vld [vmem:[%s691_s3 + $0x68] sm:$0xff]  ;;  %v139_v26 = vld [vmem:[%s691_s3 + $0x70] sm:$0xff]  ;;  %v140_v27 = vld [vmem:[%s691_s3 + $0x78] sm:$0xff] }
   0x8   :  { %380 = vmatmul.mubr.msk.f32.vlgmr.msra.gmra.mrb[0].mxu0 %vm37_vm1, %v27_v10  ;;  %463 = vmatprep.subr.bf16.mxu1 %v462_v9  ;;  %v482_v25 = vpack.c.bf16 %v138_v24, %v137_v23  ;;  %v486_v28 = vpack.c.bf16 %v140_v27, %v139_v26  ;;  %v225_v29 = vld [vmem:[%s692_s5] sm:$0xff]  ;;  %v226_v30 = vld [vmem:[%s692_s5 + $0x8] sm:$0xff]  ;;  %v227_v31 = vld [vmem:[%s692_s5 + $0x10] sm:$0xff] }
   0x9   :  { %v490_v32 = vpack.c.bf16 %v226_v30, %v225_v29  ;;  %v228_v33 = vld [vmem:[%s692_s5 + $0x18] sm:$0xff]  ;;  %v229_v35 = vld [vmem:[%s692_s5 + $0x20] sm:$0xff]  ;;  %v230_v36 = vld [vmem:[%s692_s5 + $0x28] sm:$0xff] }
   0xa   :  { %v494_v34 = vpack.c.bf16 %v228_v33, %v227_v31  ;;  %v498_v37 = vpack.c.bf16 %v230_v36, %v229_v35  ;;  %v231_v38 = vld [vmem:[%s692_s5 + $0x30] sm:$0xff]  ;;  %v232_v39 = vld [vmem:[%s692_s5 + $0x38] sm:$0xff]  ;;  %v233_v41 = vld [vmem:[%s692_s5 + $0x40] sm:$0xff] }
   0xb   :  { %465 = vmatpush3.bf16.msra.mxu1 %v462_v9  ;;  %491 = vmatprep.subr.bf16.mxu0 %v490_v32  ;;  %v502_v40 = vpack.c.bf16 %v232_v39, %v231_v38  ;;  %v234_v42 = vld [vmem:[%s692_s5 + $0x48] sm:$0xff]  ;;  %v235_v44 = vld [vmem:[%s692_s5 + $0x50] sm:$0xff]  ;;  %v236_v45 = vld [vmem:[%s692_s5 + $0x58] sm:$0xff] }
   0xc   :  { %467 = vmatprep.subr.bf16.mxu1 %v466_v13  ;;  %493 = vmatpush3.bf16.msra.mxu0 %v490_v32  ;;  %v506_v43 = vpack.c.bf16 %v234_v42, %v233_v41  ;;  %v510_v46 = vpack.c.bf16 %v236_v45, %v235_v44  ;;  %v237_v47 = vld [vmem:[%s692_s5 + $0x60] sm:$0xff]  ;;  %v238_v48 = vld [vmem:[%s692_s5 + $0x68] sm:$0xff]  ;;  %v239_v57 = vld [vmem:[%s692_s5 + $0x70] sm:$0xff] }
   0xd   :  { %495 = vmatprep.subr.bf16.mxu0 %v494_v34  ;;  %v514_v49 = vpack.c.bf16 %v238_v48, %v237_v47  ;;  %v329_v50 = vld [vmem:[%s693_s2] ss:$0 sm:$0xff]  ;;  %v240_v58 = vld [vmem:[%s692_s5 + $0x78] sm:$0xff] }
   0xe   :  { %v518_v59 = vpack.c.bf16 %v240_v58, %v239_v57  ;;  %v333_v60 = vld [vmem:[%s694_s4] ss:$0 sm:$0xff] }
   0xf   :  { %469 = vmatpush3.bf16.msra.mxu1 %v466_v13  ;;  %v334_v3 = vld [vmem:[%s695_s6] ss:$0 sm:$0xff] }
  0x10   :  { %471 = vmatprep.subr.bf16.mxu1 %v470_v16  ;;  %497 = vmatpush3.bf16.msra.mxu0 %v494_v34 }
  0x11   :  { %499 = vmatprep.subr.bf16.mxu0 %v498_v37 }
  0x13   :  { %473 = vmatpush3.bf16.msra.mxu1 %v470_v16 }
  0x14   :  { %475 = vmatprep.subr.bf16.mxu1 %v474_v19  ;;  %501 = vmatpush3.bf16.msra.mxu0 %v498_v37 }
  0x15   :  { %503 = vmatprep.subr.bf16.mxu0 %v502_v40 }
  0x17   :  { %477 = vmatpush3.bf16.msra.mxu1 %v474_v19 }
  0x18   :  { %479 = vmatprep.subr.bf16.mxu1 %v478_v22  ;;  %505 = vmatpush3.bf16.msra.mxu0 %v502_v40 }
  0x19   :  { %507 = vmatprep.subr.bf16.mxu0 %v506_v43 }
  0x1b   :  { %481 = vmatpush3.bf16.msra.mxu1 %v478_v22 }
  0x1c   :  { %483 = vmatprep.subr.bf16.mxu1 %v482_v25  ;;  %509 = vmatpush3.bf16.msra.mxu0 %v506_v43 }
  0x1d   :  { %511 = vmatprep.subr.bf16.mxu0 %v510_v46 }
  0x1f   :  { %485 = vmatpush3.bf16.msra.mxu1 %v482_v25 }
  0x20   :  { %487 = vmatprep.subr.bf16.mxu1 %v486_v28  ;;  %513 = vmatpush3.bf16.msra.mxu0 %v510_v46 }
  0x21   :  { %515 = vmatprep.subr.bf16.mxu0 %v514_v49 }
  0x23   :  { %489 = vmatpush3.bf16.msra.mxu1 %v486_v28 }
  0x24   :  { %517 = vmatpush3.bf16.msra.mxu0 %v514_v49 }
  0x25   :  { %519 = vmatprep.subr.bf16.mxu0 %v518_v59 }
  0x28   :  { %521 = vmatpush3.bf16.msra.mxu0 %v518_v59 }
  0xdb   :  { %v381_v51 = vpop.f32.mrb[0].mxu0 }
  0xdc   :  { %v120_v52 = vadd.f32 %v381_v51, %v329_v50  ;;  %v114_v53 = vpop.f32.mrb[1].mxu0 }
  0xdd   :  { %v115_v54 = vadd.f32 %v329_v50, %v114_v53 }
  0xde   :  { %v124_v56 = vmax.f32 %v120_v52, 0.0 }
  0xdf   :  { %v123_v55 = vmax.f32 %v115_v54, 0.0 }
  0xe1   :  { %414 = vmatprep.mubr.f32.mxu1 %v123_v55 }
  0xe2   :  { %415 = vmatmul.mubr.f32.vlgmr.msra.gmra.mrb[0].mxu1 %v124_v56 }
 0x1b5   :  { %v416_v61 = vpop.f32.mrb[0].mxu1 }
 0x1b6   :  { %v220_v62 = vadd.f32 %v416_v61, %v333_v60  ;;  %v214_v63 = vpop.f32.mrb[1].mxu1 }
 0x1b7   :  { %v215_v0 = vadd.f32 %v333_v60, %v214_v63 }
 0x1b8   :  { %v224_v2 = vmax.f32 %v220_v62, 0.0 }
 0x1b9   :  { %v223_v1 = vmax.f32 %v215_v0, 0.0 }
 0x1bb   :  { %449 = vmatprep.mubr.f32.mxu0 %v223_v1 }
 0x1bc   :  { %450 = vmatmul.mubr.f32.vlgmr.msra.gmra.mrb[2].mxu0 %v224_v2 }
 0x28f   :  { %v451_v4 = vpop.f32.mrb[2].mxu0 }
 0x290   :  { %v320_v5 = vadd.f32 %v451_v4, %v334_v3  ;;  %v314_v6 = vpop.f32.mrb[3].mxu0 }
 0x291   :  { %v315_v7 = vadd.f32 %v334_v3, %v314_v6 }
 0x292   :  { %324 = vst [vmem:[%s696_s7 + $0x8] sm:$0xff] %v320_v5 }
 0x293   :  { %323 = vst [vmem:[%s696_s7] sm:$0xff] %v315_v7 }

</bundles_post_ra>
